<compile_context>
chip_gen: v6e
topology: v6e:2x2x1
jax: 0.10.0
libtpu: 0.0.40
codegen_flags: <defaults>
</compile_context>

<pallas_src>
import functools

import jax
import jax.numpy as jnp
from jax import lax
from jax.experimental import pallas as pl
from jax.experimental.pallas import tpu as pltpu


# ----------------------------------------------------------------------------- kernel
def _fused_linear_kernel(x_ref, w_ref, b_ref, o_ref, *, mxu_dtype):
    """(tb, I) @ (I, tn) -> f32 accumulate -> f32 bias add -> cast -> store."""
    x = x_ref[...]
    if mxu_dtype is not None and x.dtype != mxu_dtype:
        # In-kernel downcast (VPU) hides under DMA and avoids a separate
        # un-fused XLA cast pass over x in HBM.
        x = x.astype(mxu_dtype)
    acc = jnp.dot(x, w_ref[...], preferred_element_type=jnp.float32)   # MXU, f32 acc
    o_ref[...] = (acc + b_ref[...]).astype(o_ref.dtype)                # f32 epilogue


# ----------------------------------------------------------------------------- helpers
def _vmem_cap_bytes():
    """~75% of physical per-core VMEM; conservative 48 MiB fallback (v7x-safe)."""
    try:
        return int(pltpu.get_tpu_info().vmem_capacity_bytes * 0.75)
    except Exception:
        return 48 * 1024 * 1024


def _pick_batch_tile(B, per_row_bytes, vmem_cap):
    """Largest batch tile whose double-buffered in/out tiles fit in half the VMEM
    budget (rest: resident weight, bias, slack), capped at 8192 rows.  For very
    large batches keep >= ~8 grid steps so the 'parallel' axis shards across the
    two v7x TensorCores and the pipeline has steps to overlap DMA."""
    tb_fit = max(8, (vmem_cap // 2) // max(per_row_bytes, 1))
    tb = min(tb_fit, 8192)
    if B <= tb:
        return B                                  # single tile (block dim == full dim is legal)
    eight_way = -(-B // 8)                        # cdiv(B, 8)
    if eight_way >= 1024:
        tb = min(tb, -(-eight_way // 8) * 8)      # round up to a multiple of 8
    return max(8, (tb // 8) * 8)


def _pick_out_tile(I, O, w_item, vmem_cap):
    """Full O if the resident folded weight fits ~1/4 of the budget, else a
    lane-aligned (multiple-of-128) output tile."""
    weight_budget = vmem_cap // 4
    if I * O * w_item <= weight_budget or O < 128:
        # TODO(synk): for huge I with small O, add a K grid axis with an f32
        # VMEM acc scratch + pl.when(k==0)/(k==last) instead of a resident (I, O) weight.
        return O
    tn = max(128, ((weight_budget // (I * w_item)) // 128) * 128)
    return min(tn, O)


# ----------------------------------------------------------------------------- public API
def fold_linear_params(w1, b1, w2, b2, *, mxu_dtype=None):
    """Fold the two affine layers (valid: no activation in between):
         y = (x @ W1^T + b1) @ W2^T + b2 = x @ (W1^T W2^T) + (W2 b1 + b2)
    Call once per parameter update (amortized out of the forward path).

    Returns (w_folded (I, O) in mxu_dtype-or-f32, b_folded (1, O) f32)."""
    w = lax.dot_general(w1, w2, dimension_numbers=(((0,), (1,)), ((), ())),
                        preferred_element_type=jnp.float32)                 # (I, O)
    b = jnp.dot(w2, b1, preferred_element_type=jnp.float32) + b2            # (O,)
    if mxu_dtype is not None:
        w = w.astype(mxu_dtype)          # halves weight HBM/VMEM bytes (bf16 path)
    return w, b.reshape(1, -1).astype(jnp.float32)


def linear_regression_forward_folded(x, w_folded, b_folded, *, mxu_dtype=None):
    """Forward pass given pre-folded parameters.

    x        : (B, I)
    w_folded : (I, O)   (f32 or bf16 -- see fold_linear_params)
    b_folded : (1, O)   f32
    mxu_dtype: None (keep x.dtype) or jnp.bfloat16.  bf16 operands are the
               MXU-native fast path on v5e, v6e AND v7x (epilogue stays f32).
    """
    B, I = x.shape
    O = w_folded.shape[1]
    out_dtype = x.dtype

    x_item = jnp.dtype(x.dtype).itemsize
    w_item = jnp.dtype(w_folded.dtype).itemsize
    o_item = jnp.dtype(out_dtype).itemsize

    vmem_cap = _vmem_cap_bytes()
    tn = _pick_out_tile(I, O, w_item, vmem_cap)
    per_row = 2 * (I * x_item + tn * o_item)          # double-buffered x + out tiles
    tb = _pick_batch_tile(B, per_row, vmem_cap)

    # Note: when B % tb != 0 the last grid step computes on Pallas' OOB-padded
    # rows; results stay correct (padded rows never land in the real output).
    grid = (pl.cdiv(B, tb), pl.cdiv(O, tn))

    vmem_needed = (2 * tb * I * x_item        # double-buffered input tiles
                   + 2 * tb * tn * o_item     # double-buffered output tiles
                   + I * tn * w_item          # resident folded weight block
                   + tn * 4)                  # bias (f32)
    vmem_limit = int(min(vmem_cap, max(32 * 1024 * 1024, 2 * vmem_needed)))

    kernel = functools.partial(_fused_linear_kernel, mxu_dtype=mxu_dtype)

    return pl.pallas_call(
        kernel,
        out_shape=jax.ShapeDtypeStruct((B, O), out_dtype),   # no lane padding in HBM
        grid=grid,
        in_specs=[
            pl.BlockSpec((tb, I), lambda i, j: (i, 0)),       # batch-tiled input
            pl.BlockSpec((I, tn), lambda i, j: (0, j)),       # resident folded weight
            pl.BlockSpec((1, tn), lambda i, j: (0, j)),       # folded bias (f32)
        ],
        out_specs=pl.BlockSpec((tb, tn), lambda i, j: (i, j)),
        compiler_params=pltpu.CompilerParams(
            dimension_semantics=("parallel", "parallel"),     # shard across TCs (v7x)
            vmem_limit_bytes=vmem_limit,
        ),
        cost_estimate=pl.CostEstimate(
            flops=2 * B * I * O,
            transcendentals=0,
            bytes_accessed=B * I * x_item + I * O * w_item + B * O * o_item + O * 4,
        ),
    )(x, w_folded, b_folded)


def linear_regression_forward(x, w1, b1, w2, b2, *, mxu_dtype=None):
    """One-shot convenience: fold + forward (prefer folding once per update)."""
    w, b = fold_linear_params(w1, b1, w2, b2, mxu_dtype=mxu_dtype)
    return linear_regression_forward_folded(x, w, b, mxu_dtype=mxu_dtype)


def linear_regression_ref(x, w1, b1, w2, b2):
    h = x @ w1.T + b1
    return h @ w2.T + b2


# ----------------------------------------------------------------------------- test
if __name__ == "__main__":
    # Small shapes consistent with the module: batch=8, input=32, hidden=64, output=16.
    B, IN, HID, OUT = 8, 32, 64, 16

    key = jax.random.PRNGKey(0)
    kx, kw1, kb1, kw2, kb2 = jax.random.split(key, 5)

    x = jax.random.normal(kx, (B, IN), dtype=jnp.float32)

    # Deterministic parameter init (uniform, PyTorch-Linear-like bounds).
    bound1 = 1.0 / (IN ** 0.5)
    w1 = jax.random.uniform(kw1, (HID, IN), jnp.float32, -bound1, bound1)
    b1 = jax.random.uniform(kb1, (HID,), jnp.float32, -bound1, bound1)
    bound2 = 1.0 / (HID ** 0.5)
    w2 = jax.random.uniform(kw2, (OUT, HID), jnp.float32, -bound2, bound2)
    b2 = jax.random.uniform(kb2, (OUT,), jnp.float32, -bound2, bound2)

    ref = linear_regression_ref(x, w1, b1, w2, b2)

    # f32 path: fold once, run the kernel, tight tolerance.
    w_f32, b_f32 = fold_linear_params(w1, b1, w2, b2)
    out = linear_regression_forward_folded(x, w_f32, b_f32)
    out = jax.block_until_ready(out)
    assert out.shape == (B, OUT), out.shape
    assert jnp.allclose(out, ref, atol=1e-5, rtol=1e-5), "f32 mismatch vs reference"

    # bf16 MXU fast path (recommended on v5e/v6e/v7x when tolerance allows).
    w_bf16, b_bf16 = fold_linear_params(w1, b1, w2, b2, mxu_dtype=jnp.bfloat16)
    out_bf16 = linear_regression_forward_folded(x, w_bf16, b_bf16,
                                                mxu_dtype=jnp.bfloat16)
    out_bf16 = jax.block_until_ready(out_bf16)
    assert out_bf16.shape == (B, OUT), out_bf16.shape
    assert jnp.allclose(out_bf16, ref, atol=5e-2, rtol=5e-2), "bf16 mismatch vs reference"

    print("KERNEL_OK")
</pallas_src>

<mosaic_0001>
module attributes {stable_mosaic.version = 11 : i64} {
  func.func @_fused_linear_kernel(%arg0: i32, %arg1: i32, %arg2: memref<8x32xf32, #tpu.memory_space<vmem>>, %arg3: memref<32x16xf32, #tpu.memory_space<vmem>>, %arg4: memref<1x16xf32, #tpu.memory_space<vmem>>, %arg5: memref<8x16xf32, #tpu.memory_space<vmem>>) attributes {dimension_semantics = [#tpu.dimension_semantics<parallel>, #tpu.dimension_semantics<parallel>], iteration_bounds = array<i64: 1, 1>, scalar_prefetch = 0 : i64, scratch_operands = 0 : i64, tpu.core_type = #tpu.core_type<tc>, window_params = [{transform_indices = @transform_0, window_bounds = array<i64: 8, 32>}, {transform_indices = @transform_1, window_bounds = array<i64: 32, 16>}, {transform_indices = @transform_2, window_bounds = array<i64: 1, 16>}, {transform_indices = @transform_3, window_bounds = array<i64: 8, 16>}]} {
    %c0 = arith.constant 0 : index
    %c0_0 = arith.constant 0 : index
    %0 = vector.load %arg2[%c0, %c0_0] : memref<8x32xf32, #tpu.memory_space<vmem>>, vector<8x32xf32>
    %c0_1 = arith.constant 0 : index
    %c0_2 = arith.constant 0 : index
    %1 = vector.load %arg3[%c0_1, %c0_2] : memref<32x16xf32, #tpu.memory_space<vmem>>, vector<32x16xf32>
    %cst = arith.constant dense<0.000000e+00> : vector<8x16xf32>
    %2 = tpu.matmul %0, %1, %cst {dimension_numbers = #tpu.dot_dimension_numbers<[1], [0], [0], [1], [0, 0, 1, 1], [], []>} : vector<8x32xf32>, vector<32x16xf32>, vector<8x16xf32> -> vector<8x16xf32>
    %c0_3 = arith.constant 0 : index
    %c0_4 = arith.constant 0 : index
    %3 = vector.load %arg4[%c0_3, %c0_4] : memref<1x16xf32, #tpu.memory_space<vmem>>, vector<1x16xf32>
    %4 = vector.broadcast %3 : vector<1x16xf32> to vector<8x16xf32>
    %5 = arith.addf %2, %4 : vector<8x16xf32>
    %c0_5 = arith.constant 0 : index
    %c0_6 = arith.constant 0 : index
    %6 = vector.load %arg5[%c0_5, %c0_6] : memref<8x16xf32, #tpu.memory_space<vmem>>, vector<8x16xf32>
    tpu.vector_store %arg5[%c0_5, %c0_6], %5 {strides = array<i32>} : memref<8x16xf32, #tpu.memory_space<vmem>>, vector<8x16xf32>,
    return
  }
  func.func @transform_0(%arg0: i32, %arg1: i32) -> (i32, i32) {
    %c0_i32 = arith.constant 0 : i32
    %c0_i32_0 = arith.constant 0 : i32
    return %arg0, %c0_i32 : i32, i32
  }
  func.func @transform_1(%arg0: i32, %arg1: i32) -> (i32, i32) {
    %c0_i32 = arith.constant 0 : i32
    %c0_i32_0 = arith.constant 0 : i32
    return %c0_i32, %arg1 : i32, i32
  }
  func.func @transform_2(%arg0: i32, %arg1: i32) -> (i32, i32) {
    %c0_i32 = arith.constant 0 : i32
    %c0_i32_0 = arith.constant 0 : i32
    return %c0_i32, %arg1 : i32, i32
  }
  func.func @transform_3(%arg0: i32, %arg1: i32) -> (i32, i32) {
    %c0_i32 = arith.constant 0 : i32
    return %arg0, %arg1 : i32, i32
  }
}

</mosaic_0001>

<bundles_post_ra>
// kernel: tpu_custom_call.1
= control target key start
LH: loop header
LB: loop body
LE: loop exit
PB: predicated region body
PF: predicated region fallthrough
CT: control target
= control target key end

     0   :  { %v160_v1 = vmov 0.0   ;;  %vm161_vm0 = vmmov 0   ;;  %s204_s0 = inlined_call_operand.vmem [shape: f32[8,32], index: 0, kind: input, shape index: {}]   ;;  %s205_s1 = inlined_call_operand.vmem [shape: f32[32,16], index: 1, kind: input, shape index: {}]   ;;  %s206_s2 = inlined_call_operand.vmem [shape: f32[1,16], index: 2, kind: input, shape index: {}]   ;;  %s207_s3 = inlined_call_operand.hbm [shape: f32[8,16], index: 3, kind: output, shape index: {}]  }
   0x1   :  { %v19_v0 = vld [vmem:[%s205_s1 + $0x18] sm:$0xff]  ;;  %124 = vmatprep.subr.mxu0 %v160_v1  ;;  %v18_v2 = vld [vmem:[%s205_s1 + $0x10] sm:$0xff]  ;;  %132 = vmatprep.mubr.msk.f32.mxu0 %vm161_vm0, %v160_v1 }
   0x2   :  { %125 = vmatpush3.msra.mxu0 %v19_v0 }
   0x3   :  { %8 = vsyncpa [#allocation3], 0  ;;  %126 = vmatprep.subr.mxu0 %v160_v1  ;;  %v17_v3 = vld [vmem:[%s205_s1 + $0x8] sm:$0xff]  ;;  %v16_v4 = vld [vmem:[%s205_s1] sm:$0xff]  ;;  %vm27_vm1 = vcmask 261120   ;;  %s162_s24 = smov [#allocation2]  }
   0x4   :  { %127 = vmatpush3.msra.mxu0 %v18_v2  ;;  %v15_v5 = vld [vmem:[%s204_s0] sm:$0xff]  ;;  %s109_s25 = sshll.u32 %s162_s24, 4  ;;  %vm101_vm2 = vcmask 130048   ;;  %s110_s25 = int_to_ptr.vmem [resolvable:$true] %s109_s25 }
   0x5   :  { %128 = vmatprep.subr.mxu0 %v160_v1  ;;  %v117_v6 = vld [vmem:[%s206_s2] ss:$0 sm:$0xff]  ;;  %s138_s1 = scalar_lea.vmem %s110_s25, 128  ;;  %p143_p1 = scmp.lt.s32.totalorder %s110_s25, %s110_s25 }
   0x6   :  { %129 = vmatpush3.msra.mxu0 %v17_v3  ;;  %p139_p0 = scmp.ne.s32.totalorder %s110_s25, %s138_s1  ;;  %p144_p2 = scmp.lt.s32.totalorder %s138_s1, %s138_s1 }
   0x7   :  { %130 = vmatprep.subr.mxu0 %v160_v1 }
   0x8   :  { %131 = vmatpush3.msra.mxu0 %v16_v4  ;;  %p145_p3 = por %p144_p2, %p143_p1 }
   0x9   :  { %133 = vmatmul.mubr.msk.f32.vlgmr.msra.gmra.mxu0 %vm27_vm1, %v15_v5 }
   0xa   :  { %p146_p4 = pnand %p145_p3, %p139_p0 }
  0xc9   :  { %v97_v7 = vpop.f32.mrf.mxu0 }
  0xca   :  { %v98_v8 = vadd.f32 %v117_v6, %v97_v7 }
  0xcb   :  { %v134_v9 = vpop.f32.mrf.mxu0 }
  0xcc   :  { %102 = vst.msk [vmem:[#allocation2] sm:$0xff] %vm101_vm2, %v98_v8 }
  0xcd   :  { %149 = shalt.err (!%p146_p4)
}
  0xce   :  { %112 = dma.vmem_to_hbm [thread:$0]  %s110_s25, 128, %s207_s3, [#allocation3]  }
  0xcf   :  { %158 = dma.done.wait [#allocation3], 128  }
  0xd0   :  { %159 = vsyncadd [#allocation3], 4294967168 }
  0xd1   :  { %116 = vsyncpa [#allocation3], 1 }

</bundles_post_ra>
